<compile_context>
chip_gen: v5e
topology: v5e:2x2
jax: 0.10.0
libtpu: 0.0.40
codegen_flags: <defaults>
</compile_context>

<pallas_src>
import jax
import jax.numpy as jnp
from jax.experimental import pallas as pl
from jax.experimental.pallas import tpu as pltpu


def _round_up(n, m):
    return ((n + m - 1) // m) * m


def _policy_kernel(x_ref, w1p_ref, w2_ref, b2_ref, w3_ref, b3_ref, o_ref):
    # fc1 (+ bias folded into column 5 of w1p): [128, 8] @ [8, TB] on the MXU.
    # K = 8 is padded internally by the MXU; the cost is negligible next to fc2, and it keeps
    # the VALU free (the previous FMA-chain fc1 rivalled the fc2 matmul at large TB).
    z1 = jnp.dot(w1p_ref[...], x_ref[...], preferred_element_type=jnp.float32)   # [128, TB]
    h1 = jnp.tanh(z1)

    # fc2: dense 128x128 matmul in bf16 on the MXU (w2 already bf16), f32 accumulation.
    z2 = jnp.dot(w2_ref[...], h1.astype(jnp.bfloat16),
                 preferred_element_type=jnp.float32) + b2_ref[...]               # [128, TB]
    h2 = jnp.tanh(z2)

    # fc3: N=1 output as elementwise multiply + cross-sublane reduction (XLU) instead of a
    # degenerate matmul.  Output tile [1, TB] is lane-dense (no masked partial stores).
    o_ref[...] = (jnp.sum(w3_ref[...] * h2, axis=0, keepdims=True)
                  + b3_ref[...]).astype(o_ref.dtype)                             # [1, TB]


def policy_forward(up_price, down_price, exercise_price, cash, risk_free_factor, params,
                   *, max_tile=4096):
    """Forward pass matching Policy.forward; returns [B, 1] float32."""
    w1, b1, w2, b2, w3t, b3 = params
    B = up_price.shape[0]

    # ---- batch tiling --------------------------------------------------------------------
    # Multiple of 256 keeps the 256-wide MXU feed dense on v6e/v7x (128-aligned suffices for
    # v5e).  max_tile=4096 f32 keeps the per-step activation footprint ~10-12 MiB, safely under
    # v7x's 64 MiB/TC.  When the whole batch would fit in a single tile but is big enough,
    # split it into 2 tiles so v7x's two TensorCores both get work.
    padded = _round_up(B, 256)
    TB = min(max_tile, padded)
    if padded // TB < 2 and padded >= 512:
        TB = _round_up(padded // 2, 256)
    Bp = _round_up(B, TB)
    grid = (Bp // TB,)

    # ---- pack the 5 features (+ ones row for the bias trick) into one [8, Bp] input --------
    feats5 = jnp.stack([up_price, down_price, exercise_price, cash, risk_free_factor],
                       axis=0).astype(jnp.float32)                               # [5, B]
    x = jnp.concatenate([feats5,
                         jnp.ones((1, B), jnp.float32),
                         jnp.zeros((2, B), jnp.float32)], axis=0)                # [8, B]
    if Bp != B:
        x = jnp.pad(x, ((0, 0), (0, Bp - B)))                                    # [8, Bp]

    # ---- pack fc1 weight + bias into [128, 8]; pre-cast w2 to bf16 (once, outside the grid) --
    w1p = jnp.zeros((128, 8), jnp.float32)
    w1p = w1p.at[:, :5].set(w1)
    w1p = w1p.at[:, 5:6].set(b1)
    w2_bf16 = w2.astype(jnp.bfloat16)

    def resident(shape):                       # weights: same block every grid step (VMEM-resident)
        return pl.BlockSpec(shape, lambda i: (0, 0))

    cost = pl.CostEstimate(
        flops=2 * Bp * (8 * 128 + 128 * 128 + 128),
        transcendentals=2 * 128 * Bp,
        bytes_accessed=(8 * Bp * 4 + Bp * 4
                        + 128 * 8 * 4 + 128 * 128 * 2 + 128 * 4 + 128 * 4 + 4),
    )

    out = pl.pallas_call(
        _policy_kernel,
        out_shape=jax.ShapeDtypeStruct((1, Bp), jnp.float32),
        grid=grid,
        in_specs=[
            pl.BlockSpec((8, TB), lambda i: (0, i)),       # packed features
            resident(w1p.shape),                           # [128, 8]  f32 (w1 | b1 | 0 0)
            resident(w2_bf16.shape),                       # [128, 128] bf16
            resident(b2.shape),                            # [128, 1]  f32
            resident(w3t.shape),                           # [128, 1]  f32
            resident(b3.shape),                            # [1, 1]    f32
        ],
        out_specs=pl.BlockSpec((1, TB), lambda i: (0, i)),
        compiler_params=pltpu.CompilerParams(
            dimension_semantics=("parallel",),
            vmem_limit_bytes=40 * 1024 * 1024,
        ),
        cost_estimate=cost,
    )(x, w1p, w2_bf16, b2, w3t, b3)

    return out[0, :B].reshape(B, 1)


def init_params(key):
    # Deterministic init mirroring nn.Linear's U(-1/sqrt(fan_in), 1/sqrt(fan_in)).
    # Weights kept in PyTorch [out, in] layout (natural for the batch-in-lanes kernel);
    # w3 stored transposed ([128, 1]) for the lane-dense fc3 reduce.
    def linear(key, fan_in, fan_out):
        kw, kb = jax.random.split(key)
        bound = 1.0 / (fan_in ** 0.5)
        w = jax.random.uniform(kw, (fan_out, fan_in), jnp.float32, -bound, bound)
        b = jax.random.uniform(kb, (fan_out, 1), jnp.float32, -bound, bound)
        return w, b

    k1, k2, k3 = jax.random.split(key, 3)
    w1, b1 = linear(k1, 5, 128)       # [128, 5],   [128, 1]
    w2, b2 = linear(k2, 128, 128)     # [128, 128], [128, 1]
    w3, b3 = linear(k3, 128, 1)       # [1, 128],   [1, 1]
    return (w1, b1, w2, b2, w3.T, b3)


def policy_forward_ref(up, dn, ex, ca, rf, params):
    # Pure-JAX f32 reference (mirrors the PyTorch module exactly).
    x = jnp.stack([up, dn, ex, ca, rf], axis=1).astype(jnp.float32)   # [B, 5]
    w1, b1, w2, b2, w3t, b3 = params
    h1 = jnp.tanh(x @ w1.T + b1[:, 0])
    h2 = jnp.tanh(h1 @ w2.T + b2[:, 0])
    return h2 @ w3t + b3[0]                                           # [B, 1]


if __name__ == "__main__":
    key = jax.random.PRNGKey(0)
    pkey, dkey = jax.random.split(key)
    params = init_params(pkey)

    def make_inputs(k, B):
        k1, k2, k3, k4 = jax.random.split(k, 4)
        up = jax.random.uniform(k1, (B,), jnp.float32, 0.5, 2.0)
        dn = jax.random.uniform(k2, (B,), jnp.float32, 0.1, 1.0)
        ex = jax.random.uniform(k3, (B,), jnp.float32, 0.5, 1.5)
        ca = jax.random.uniform(k4, (B,), jnp.float32, 0.0, 1.0)
        rf = jnp.full((B,), 1.05, jnp.float32)
        return up, dn, ex, ca, rf

    # Tiny batch (as in the assignment), a non-aligned batch that exercises the multi-tile grid
    # + padding path, and a larger batch that exercises the bigger default tile.
    # Tolerance relaxed vs the f32-only version because fc2 runs in bf16 on the MXU.
    for B in (8, 1300, 9000):
        inputs = make_inputs(dkey, B)
        out = jax.block_until_ready(policy_forward(*inputs, params))
        ref = policy_forward_ref(*inputs, params)
        assert out.shape == (B, 1)
        assert jnp.allclose(out, ref, atol=2e-2, rtol=2e-2), float(jnp.max(jnp.abs(out - ref)))

    print("KERNEL_OK")
</pallas_src>

<mosaic_0001>
module attributes {stable_mosaic.version = 11 : i64} {
  func.func @_policy_kernel(%arg0: i32, %arg1: memref<8x256xf32, #tpu.memory_space<vmem>>, %arg2: memref<128x8xf32, #tpu.memory_space<vmem>>, %arg3: memref<128x128xbf16, #tpu.memory_space<vmem>>, %arg4: memref<128x1xf32, #tpu.memory_space<vmem>>, %arg5: memref<128x1xf32, #tpu.memory_space<vmem>>, %arg6: memref<1x1xf32, #tpu.memory_space<vmem>>, %arg7: memref<1x256xf32, #tpu.memory_space<vmem>>) attributes {dimension_semantics = [#tpu.dimension_semantics<parallel>], iteration_bounds = array<i64: 1>, scalar_prefetch = 0 : i64, scratch_operands = 0 : i64, tpu.core_type = #tpu.core_type<tc>, window_params = [{transform_indices = @transform_0, window_bounds = array<i64: 8, 256>}, {pipeline_mode = #tpu.pipeline_mode<synchronous>, transform_indices = @transform_1, window_bounds = array<i64: 128, 8>}, {pipeline_mode = #tpu.pipeline_mode<synchronous>, transform_indices = @transform_2, window_bounds = array<i64: 128, 128>}, {pipeline_mode = #tpu.pipeline_mode<synchronous>, transform_indices = @transform_3, window_bounds = array<i64: 128, 1>}, {pipeline_mode = #tpu.pipeline_mode<synchronous>, transform_indices = @transform_4, window_bounds = array<i64: 128, 1>}, {pipeline_mode = #tpu.pipeline_mode<synchronous>, transform_indices = @transform_5, window_bounds = array<i64: 1, 1>}, {transform_indices = @transform_6, window_bounds = array<i64: 1, 256>}]} {
    %c0 = arith.constant 0 : index
    %c0_0 = arith.constant 0 : index
    %0 = vector.load %arg2[%c0, %c0_0] : memref<128x8xf32, #tpu.memory_space<vmem>>, vector<128x8xf32>
    %c0_1 = arith.constant 0 : index
    %c0_2 = arith.constant 0 : index
    %1 = vector.load %arg1[%c0_1, %c0_2] : memref<8x256xf32, #tpu.memory_space<vmem>>, vector<8x256xf32>
    %cst = arith.constant dense<0.000000e+00> : vector<128x256xf32>
    %2 = tpu.matmul %0, %1, %cst {dimension_numbers = #tpu.dot_dimension_numbers<[1], [0], [0], [1], [0, 0, 1, 1], [], []>} : vector<128x8xf32>, vector<8x256xf32>, vector<128x256xf32> -> vector<128x256xf32>
    %3 = math.tanh %2 : vector<128x256xf32>
    %c0_3 = arith.constant 0 : index
    %c0_4 = arith.constant 0 : index
    %4 = vector.load %arg3[%c0_3, %c0_4] : memref<128x128xbf16, #tpu.memory_space<vmem>>, vector<128x128xbf16>
    %5 = arith.truncf %3 : vector<128x256xf32> to vector<128x256xbf16>
    %cst_5 = arith.constant dense<0.000000e+00> : vector<128x256xf32>
    %6 = tpu.matmul %4, %5, %cst_5 {dimension_numbers = #tpu.dot_dimension_numbers<[1], [0], [0], [1], [0, 0, 1, 1], [], []>} : vector<128x128xbf16>, vector<128x256xbf16>, vector<128x256xf32> -> vector<128x256xf32>
    %c0_6 = arith.constant 0 : index
    %c0_7 = arith.constant 0 : index
    %7 = vector.load %arg4[%c0_6, %c0_7] : memref<128x1xf32, #tpu.memory_space<vmem>>, vector<128x1xf32>
    %8 = vector.broadcast %7 : vector<128x1xf32> to vector<128x256xf32>
    %9 = arith.addf %6, %8 : vector<128x256xf32>
    %10 = math.tanh %9 : vector<128x256xf32>
    %c0_8 = arith.constant 0 : index
    %c0_9 = arith.constant 0 : index
    %11 = vector.load %arg5[%c0_8, %c0_9] : memref<128x1xf32, #tpu.memory_space<vmem>>, vector<128x1xf32>
    %12 = vector.broadcast %11 : vector<128x1xf32> to vector<128x256xf32>
    %13 = arith.mulf %12, %10 : vector<128x256xf32>
    %cst_10 = arith.constant dense<0.000000e+00> : vector<256xf32>
    %14 = vector.multi_reduction <add>, %13, %cst_10 [0] : vector<128x256xf32> to vector<256xf32>
    %15 = vector.shape_cast %14 : vector<256xf32> to vector<1x256xf32>
    %c0_11 = arith.constant 0 : index
    %c0_12 = arith.constant 0 : index
    %16 = vector.load %arg6[%c0_11, %c0_12] : memref<1x1xf32, #tpu.memory_space<vmem>>, vector<1x1xf32>
    %17 = vector.broadcast %16 : vector<1x1xf32> to vector<1x256xf32>
    %18 = arith.addf %15, %17 : vector<1x256xf32>
    %c0_13 = arith.constant 0 : index
    %c0_14 = arith.constant 0 : index
    %19 = vector.load %arg7[%c0_13, %c0_14] : memref<1x256xf32, #tpu.memory_space<vmem>>, vector<1x256xf32>
    tpu.vector_store %arg7[%c0_13, %c0_14], %18 {strides = array<i32>} : memref<1x256xf32, #tpu.memory_space<vmem>>, vector<1x256xf32>,
    return
  }
  func.func @transform_0(%arg0: i32) -> (i32, i32) {
    %c0_i32 = arith.constant 0 : i32
    %c0_i32_0 = arith.constant 0 : i32
    return %c0_i32, %arg0 : i32, i32
  }
  func.func @transform_1(%arg0: i32) -> (i32, i32) {
    %c0_i32 = arith.constant 0 : i32
    %c0_i32_0 = arith.constant 0 : i32
    %c0_i32_1 = arith.constant 0 : i32
    return %c0_i32, %c0_i32_0 : i32, i32
  }
  func.func @transform_2(%arg0: i32) -> (i32, i32) {
    %c0_i32 = arith.constant 0 : i32
    %c0_i32_0 = arith.constant 0 : i32
    %c0_i32_1 = arith.constant 0 : i32
    return %c0_i32, %c0_i32_0 : i32, i32
  }
  func.func @transform_3(%arg0: i32) -> (i32, i32) {
    %c0_i32 = arith.constant 0 : i32
    %c0_i32_0 = arith.constant 0 : i32
    %c0_i32_1 = arith.constant 0 : i32
    return %c0_i32, %c0_i32_0 : i32, i32
  }
  func.func @transform_4(%arg0: i32) -> (i32, i32) {
    %c0_i32 = arith.constant 0 : i32
    %c0_i32_0 = arith.constant 0 : i32
    %c0_i32_1 = arith.constant 0 : i32
    return %c0_i32, %c0_i32_0 : i32, i32
  }
  func.func @transform_5(%arg0: i32) -> (i32, i32) {
    %c0_i32 = arith.constant 0 : i32
    %c0_i32_0 = arith.constant 0 : i32
    %c0_i32_1 = arith.constant 0 : i32
    return %c0_i32, %c0_i32_0 : i32, i32
  }
  func.func @transform_6(%arg0: i32) -> (i32, i32) {
    %c0_i32 = arith.constant 0 : i32
    %c0_i32_0 = arith.constant 0 : i32
    return %c0_i32, %arg0 : i32, i32
  }
}

</mosaic_0001>

<bundles_post_ra>
// kernel: tpu_custom_call.1
= control target key start
LH: loop header
LB: loop body
LE: loop exit
PB: predicated region body
PF: predicated region fallthrough
CT: control target
= control target key end

     0   :  { %s1379_s0 = inlined_call_operand.vmem [shape: f32[8,256], index: 0, kind: input, shape index: {}]   ;;  %s1380_s1 = inlined_call_operand.vmem [shape: f32[128,8], index: 1, kind: input, shape index: {}]   ;;  %s1381_s2 = inlined_call_operand.vmem [shape: bf16[128,128], index: 2, kind: input, shape index: {}]   ;;  %s1382_s3 = inlined_call_operand.vmem [shape: f32[128,1], index: 3, kind: input, shape index: {}]   ;;  %s1383_s4 = inlined_call_operand.vmem [shape: f32[128,1], index: 4, kind: input, shape index: {}]   ;;  %s1384_s5 = inlined_call_operand.<no memory space> [shape: f32[1,1], index: 5, kind: input, shape index: {}]   ;;  %s1385_s6 = inlined_call_operand.hbm [shape: f32[1,256], index: 6, kind: output, shape index: {}]  }
   0x1   :  { %v11_v0 = vstv %s1384_s5 }
   0x2   :  { %12 = vst [vmem:[#allocation2] sm:$0x1] %v11_v0 }
   0x3   :  { %v42_v1 = vld [vmem:[%s1379_s0] sm:$0xff]  ;;  %v43_v2 = vld [vmem:[%s1379_s0 + $0x8] sm:$0xff]  ;;  %vm44_vm0 = vcmask 64512  }
   0x4   :  { %v26_v3 = vld [vmem:[%s1380_s1] sm:$0xff]  ;;  %108 = vmatpush.msra.mxu0 %v42_v1  ;;  %173 = vmatpush.msra.mxu1 %v43_v2 }
   0x5   :  { %767 = vmatmul.msk.f32.vlgmr.msra.gmra.mxu0 %vm44_vm0, %v26_v3  ;;  %783 = vmatmul.msk.f32.vlgmr.msra.gmra.mxu1 %vm44_vm0, %v26_v3 }
   0x6   :  { %13 = vsyncpa [#allocation4], 0  ;;  %v27_v4 = vld [vmem:[%s1380_s1 + $0x8] sm:$0xff]  ;;  %v28_v5 = vld [vmem:[%s1380_s1 + $0x10] sm:$0xff]  ;;  %s758_s30 = sshll.u32 %s1385_s6, 4  ;;  %vm743_vm1 = vcmask 1040384   ;;  %s759_s30 = int_to_ptr.hbm [resolvable:$true] %s758_s30 }
   0x7   :  { %v29_v6 = vld [vmem:[%s1380_s1 + $0x18] sm:$0xff]  ;;  %v30_v7 = vld [vmem:[%s1380_s1 + $0x20] sm:$0xff]  ;;  %v31_v8 = vld [vmem:[%s1380_s1 + $0x28] sm:$0xff] }
   0x8   :  { %v32_v9 = vld [vmem:[%s1380_s1 + $0x30] sm:$0xff]  ;;  %v33_v10 = vld [vmem:[%s1380_s1 + $0x38] sm:$0xff]  ;;  %v34_v11 = vld [vmem:[%s1380_s1 + $0x40] sm:$0xff] }
   0x9   :  { %v35_v12 = vld [vmem:[%s1380_s1 + $0x48] sm:$0xff]  ;;  %v36_v13 = vld [vmem:[%s1380_s1 + $0x50] sm:$0xff]  ;;  %v37_v14 = vld [vmem:[%s1380_s1 + $0x58] sm:$0xff] }
   0xa   :  { %v38_v15 = vld [vmem:[%s1380_s1 + $0x60] sm:$0xff]  ;;  %v39_v16 = vld [vmem:[%s1380_s1 + $0x68] sm:$0xff]  ;;  %v40_v17 = vld [vmem:[%s1380_s1 + $0x70] sm:$0xff] }
   0xb   :  { %v41_v18 = vld [vmem:[%s1380_s1 + $0x78] sm:$0xff] }
   0xd   :  { %768 = vmatmul.msk.f32.gmra.mxu0 %vm44_vm0, %v27_v4  ;;  %784 = vmatmul.msk.f32.gmra.mxu1 %vm44_vm0, %v27_v4 }
  0x15   :  { %769 = vmatmul.msk.f32.gmra.mxu0 %vm44_vm0, %v28_v5  ;;  %785 = vmatmul.msk.f32.gmra.mxu1 %vm44_vm0, %v28_v5 }
  0x1d   :  { %770 = vmatmul.msk.f32.gmra.mxu0 %vm44_vm0, %v29_v6  ;;  %786 = vmatmul.msk.f32.gmra.mxu1 %vm44_vm0, %v29_v6 }
  0x25   :  { %771 = vmatmul.msk.f32.gmra.mxu0 %vm44_vm0, %v30_v7  ;;  %787 = vmatmul.msk.f32.gmra.mxu1 %vm44_vm0, %v30_v7  ;;  %v287_v7 = vld [vmem:[%s1382_s3] sm:$0xff] }
  0x2d   :  { %772 = vmatmul.msk.f32.gmra.mxu0 %vm44_vm0, %v31_v8  ;;  %788 = vmatmul.msk.f32.gmra.mxu1 %vm44_vm0, %v31_v8 }
  0x35   :  { %773 = vmatmul.msk.f32.gmra.mxu0 %vm44_vm0, %v32_v9  ;;  %789 = vmatmul.msk.f32.gmra.mxu1 %vm44_vm0, %v32_v9 }
  0x3d   :  { %774 = vmatmul.msk.f32.gmra.mxu0 %vm44_vm0, %v33_v10  ;;  %790 = vmatmul.msk.f32.gmra.mxu1 %vm44_vm0, %v33_v10  ;;  %v998_v10 = vmov 0  }
  0x3e   :  { %841 = vset.pattern.permute.xlu0 %v998_v10  ;;  %842 = vset.pattern.permute.xlu1 %v998_v10 }
  0x3f   :  { %305 = vperm.xlu0 %841, %v287_v7   ;;  %843 = vset.pattern.permute.xlu2 %v998_v10  ;;  %v292_v7 = vld [vmem:[%s1382_s3 + $0x28] sm:$0xff] }
  0x40   :  { %v836_v10 = vld [vmem:[%s1381_s2 + $0x28] sm:$0xff] }
  0x45   :  { %775 = vmatmul.msk.f32.gmra.mxu0 %vm44_vm0, %v34_v11  ;;  %791 = vmatmul.msk.f32.gmra.mxu1 %vm44_vm0, %v34_v11  ;;  %v289_v11 = vld [vmem:[%s1382_s3 + $0x10] sm:$0xff] }
  0x46   :  { %315 = vperm.xlu1 %842, %v289_v11   ;;  %v837_v11 = vld [vmem:[%s1381_s2 + $0x30] sm:$0xff] }
  0x4d   :  { %776 = vmatmul.msk.f32.gmra.mxu0 %vm44_vm0, %v35_v12  ;;  %792 = vmatmul.msk.f32.gmra.mxu1 %vm44_vm0, %v35_v12  ;;  %v288_v12 = vld [vmem:[%s1382_s3 + $0x8] sm:$0xff] }
  0x4e   :  { %310 = vperm.xlu0 %841, %v288_v12  }
  0x55   :  { %777 = vmatmul.msk.f32.gmra.mxu0 %vm44_vm0, %v36_v13  ;;  %793 = vmatmul.msk.f32.gmra.mxu1 %vm44_vm0, %v36_v13 }
  0x5d   :  { %778 = vmatmul.msk.f32.gmra.mxu0 %vm44_vm0, %v37_v14  ;;  %794 = vmatmul.msk.f32.gmra.mxu1 %vm44_vm0, %v37_v14 }
  0x65   :  { %779 = vmatmul.msk.f32.gmra.mxu0 %vm44_vm0, %v38_v15  ;;  %795 = vmatmul.msk.f32.gmra.mxu1 %vm44_vm0, %v38_v15  ;;  %v290_v15 = vld [vmem:[%s1382_s3 + $0x18] sm:$0xff] }
  0x66   :  { %320 = vperm.xlu1 %842, %v290_v15  }
  0x6d   :  { %780 = vmatmul.msk.f32.gmra.mxu0 %vm44_vm0, %v39_v16  ;;  %796 = vmatmul.msk.f32.gmra.mxu1 %vm44_vm0, %v39_v16 }
  0x75   :  { %781 = vmatmul.msk.f32.gmra.mxu0 %vm44_vm0, %v40_v17  ;;  %797 = vmatmul.msk.f32.gmra.mxu1 %vm44_vm0, %v40_v17 }
  0x7d   :  { %782 = vmatmul.msk.f32.gmra.mxu0 %vm44_vm0, %v41_v18  ;;  %798 = vmatmul.msk.f32.gmra.mxu1 %vm44_vm0, %v41_v18 }
  0x82   :  { %v110_v19 = vpop.f32.mrf.mxu0  ;;  %v175_v20 = vpop.f32.mrf.mxu1 }
  0x83   :  { %844 = vtanh.f32 %v110_v19  ;;  %v293_v19 = vld [vmem:[%s1382_s3 + $0x30] sm:$0xff] }
  0x84   :  { %846 = vtanh.f32 %v175_v20  ;;  %335 = vperm.xlu0 %841, %v293_v19  }
  0x89   :  { %v1124_v23 = vpop.eup %844 }
  0x8a   :  { %v113_v21 = vpop.f32.mrf.mxu0  ;;  %v178_v22 = vpop.f32.mrf.mxu1 }
  0x8b   :  { %848 = vtanh.f32 %v113_v21  ;;  %v1126_v24 = vpop.eup %846 }
  0x8c   :  { %850 = vtanh.f32 %v178_v22 }
  0x91   :  { %v1128_v25 = vpop.eup %848 }
  0x92   :  { %v1130_v26 = vpop.eup %850  ;;  %v116_v27 = vpop.f32.mrf.mxu0  ;;  %v271_v29 = vpack.c.bf16 %v1128_v25, %v1124_v23  ;;  %v298_v23 = vld [vmem:[%s1382_s3 + $0x58] sm:$0xff]  ;;  %v566_v25 = vld [vmem:[%s1383_s4 + $0x28] sm:$0xff] }
  0x93   :  { %v181_v28 = vpop.f32.mrf.mxu1  ;;  %v272_v30 = vpack.c.bf16 %v1130_v26, %v1126_v24  ;;  %852 = vtanh.f32 %v116_v27  ;;  %v301_v24 = vld [vmem:[%s1382_s3 + $0x70] sm:$0xff] }
  0x94   :  { %854 = vtanh.f32 %v181_v28  ;;  %v567_v26 = vld [vmem:[%s1383_s4 + $0x30] sm:$0xff] }
  0x99   :  { %v1136_v33 = vpop.eup %852 }
  0x9a   :  { %v119_v31 = vpop.f32.mrf.mxu0  ;;  %v1138_v34 = vpop.eup %854 }
  0x9b   :  { %v184_v32 = vpop.f32.mrf.mxu1  ;;  %856 = vtanh.f32 %v119_v31  ;;  %v294_v31 = vld [vmem:[%s1382_s3 + $0x38] sm:$0xff] }
  0x9c   :  { %858 = vtanh.f32 %v184_v32  ;;  %340 = vperm.xlu1 %842, %v294_v31  }
  0xa1   :  { %v1140_v35 = vpop.eup %856 }
  0xa2   :  { %v1142_v36 = vpop.eup %858  ;;  %v122_v37 = vpop.f32.mrf.mxu0  ;;  %v273_v39 = vpack.c.bf16 %v1140_v35, %v1136_v33  ;;  %v564_v33 = vld [vmem:[%s1383_s4 + $0x18] sm:$0xff]  ;;  %v562_v35 = vld [vmem:[%s1383_s4 + $0x8] sm:$0xff] }
  0xa3   :  { %v187_v38 = vpop.f32.mrf.mxu1  ;;  %v274_v40 = vpack.c.bf16 %v1142_v36, %v1138_v34  ;;  %860 = vtanh.f32 %v122_v37  ;;  %v291_v37 = vld [vmem:[%s1382_s3 + $0x20] sm:$0xff]  ;;  %v570_v34 = vld [vmem:[%s1383_s4 + $0x48] sm:$0xff]  ;;  %v572_v36 = vld [vmem:[%s1383_s4 + $0x58] sm:$0xff] }
  0xa4   :  { %862 = vtanh.f32 %v187_v38  ;;  %325 = vperm.xlu2 %843, %v291_v37  }
  0xa9   :  { %v1148_v43 = vpop.eup %860 }
  0xaa   :  { %v125_v41 = vpop.f32.mrf.mxu0  ;;  %v1150_v44 = vpop.eup %862 }
  0xab   :  { %v190_v42 = vpop.f32.mrf.mxu1  ;;  %864 = vtanh.f32 %v125_v41 }
  0xac   :  { %866 = vtanh.f32 %v190_v42  ;;  %330 = vperm.xlu2 %843, %v292_v7  }
  0xb1   :  { %v1152_v45 = vpop.eup %864  ;;  %v306_v12 = vpop.permute.xlu0 %305 }
  0xb2   :  { %v1154_v46 = vpop.eup %866  ;;  %v128_v47 = vpop.f32.mrf.mxu0  ;;  %v275_v49 = vpack.c.bf16 %v1152_v45, %v1148_v43  ;;  %v831_v43 = vld [vmem:[%s1381_s2] sm:$0xff]  ;;  %v833_v45 = vld [vmem:[%s1381_s2 + $0x10] sm:$0xff] }
  0xb3   :  { %v193_v48 = vpop.f32.mrf.mxu1  ;;  %v276_v50 = vpack.c.bf16 %v1154_v46, %v1150_v44  ;;  %868 = vtanh.f32 %v128_v47  ;;  %v563_v44 = vld [vmem:[%s1383_s4 + $0x10] sm:$0xff] }
  0xb4   :  { %870 = vtanh.f32 %v193_v48  ;;  %v575_v46 = vld [vmem:[%s1383_s4 + $0x70] sm:$0xff] }
  0xb9   :  { %v1160_v53 = vpop.eup %868 }
  0xba   :  { %v131_v51 = vpop.f32.mrf.mxu0  ;;  %v1162_v54 = vpop.eup %870 }
  0xbb   :  { %v196_v52 = vpop.f32.mrf.mxu1  ;;  %872 = vtanh.f32 %v131_v51  ;;  %v296_v51 = vld [vmem:[%s1382_s3 + $0x48] sm:$0xff] }
  0xbc   :  { %874 = vtanh.f32 %v196_v52  ;;  %350 = vperm.xlu0 %841, %v296_v51  }
  0xc0   :  { %v311_v15 = vpop.permute.xlu0 %310 }
  0xc1   :  { %v1164_v55 = vpop.eup %872 }
  0xc2   :  { %v1166_v56 = vpop.eup %874  ;;  %v1168_v57 = vpop.f32.mrf.mxu0  ;;  %v277_v59 = vpack.c.bf16 %v1164_v55, %v1160_v53  ;;  %v302_v53 = vld [vmem:[%s1382_s3 + $0x78] sm:$0xff]  ;;  %v295_v55 = vld [vmem:[%s1382_s3 + $0x40] sm:$0xff] }
  0xc3   :  { %v1170_v58 = vpop.f32.mrf.mxu1  ;;  %v278_v60 = vpack.c.bf16 %v1166_v56, %v1162_v54  ;;  %v561_v54 = vld [vmem:[%s1383_s4] sm:$0xff]  ;;  %345 = vperm.xlu2 %843, %v295_v55   ;;  %v571_v56 = vld [vmem:[%s1383_s4 + $0x50] sm:$0xff] }
  0xca   :  { %v137_v61 = vpop.f32.mrf.mxu0 }
  0xcb   :  { %v202_v62 = vpop.f32.mrf.mxu1  ;;  %360 = vperm.xlu2 %843, %v298_v23  }
  0xd2   :  { %v140_v63 = vpop.f32.mrf.mxu0 }
  0xd3   :  { %v205_v0 = vpop.f32.mrf.mxu1  ;;  %375 = vperm.xlu2 %843, %v301_v24  }
  0xda   :  { %v143_v1 = vpop.f32.mrf.mxu0 }
  0xdb   :  { %v208_v2 = vpop.f32.mrf.mxu1  ;;  %584 = vperm.xlu2 %843, %v562_v35  }
  0xe2   :  { %v146_v3 = vpop.f32.mrf.mxu0 }
  0xe3   :  { %v211_v4 = vpop.f32.mrf.mxu1 }
  0xea   :  { %v149_v5 = vpop.f32.mrf.mxu0 }
  0xeb   :  { %v214_v6 = vpop.f32.mrf.mxu1 }
  0xf2   :  { %v152_v8 = vpop.f32.mrf.mxu0 }
  0xf3   :  { %v217_v9 = vpop.f32.mrf.mxu1  ;;  %876 = vtanh.f32 %v152_v8  ;;  %v731_v8 = vld [vmem:[#allocation2] sm:$0x1] }
  0xf4   :  { %878 = vtanh.f32 %v217_v9  ;;  %v835_v9 = vld [vmem:[%s1381_s2 + $0x20] sm:$0xff] }
  0xf6   :  { %v1326_v19 = vpop.permute.xlu0 %335 }
  0xf9   :  { %v877_v16 = vpop.eup %876 }
  0xfa   :  { %v155_v13 = vpop.f32.mrf.mxu0  ;;  %v879_v17 = vpop.eup %878 }
  0xfb   :  { %v220_v14 = vpop.f32.mrf.mxu1  ;;  %880 = vtanh.f32 %v155_v13  ;;  %v316_v13 = vpop.permute.xlu1 %315 }
  0xfc   :  { %882 = vtanh.f32 %v220_v14 }
  0xfd   :  { %884 = vtanh.f32 %v149_v5  ;;  %v299_v5 = vld [vmem:[%s1382_s3 + $0x60] sm:$0xff] }
  0xfe   :  { %886 = vtanh.f32 %v214_v6  ;;  %365 = vperm.xlu0 %841, %v299_v5   ;;  %v300_v6 = vld [vmem:[%s1382_s3 + $0x68] sm:$0xff]  ;;  %v1319_v14 = vpop.permute.xlu2 %325 }
  0xff   :  { %888 = vtanh.f32 %v146_v3 }
 0x100   :  { %890 = vtanh.f32 %v211_v4 }
 0x101   :  { %v881_v18 = vpop.eup %880  ;;  %892 = vtanh.f32 %v143_v1 }
 0x102   :  { %v883_v20 = vpop.eup %882  ;;  %894 = vtanh.f32 %v208_v2  ;;  %v285_v21 = vpack.c.bf16 %v881_v18, %v877_v16  ;;  %v838_v18 = vld [vmem:[%s1381_s2 + $0x38] sm:$0xff] }
 0x103   :  { %v885_v22 = vpop.eup %884  ;;  %896 = vtanh.f32 %v140_v63  ;;  %v286_v27 = vpack.c.bf16 %v883_v20, %v879_v17  ;;  %v321_v16 = vpop.permute.xlu1 %320 }
 0x104   :  { %v887_v28 = vpop.eup %886  ;;  %898 = vtanh.f32 %v205_v0  ;;  %431 = vmatpush.bf16.msra.mxu2 %v285_v21 }
 0x105   :  { %v889_v32 = vpop.eup %888  ;;  %900 = vtanh.f32 %v137_v61  ;;  %480 = vmatpush.bf16.msra.mxu3 %v286_v27 }
 0x106   :  { %v891_v38 = vpop.eup %890  ;;  %902 = vtanh.f32 %v202_v62  ;;  %v283_v41 = vpack.c.bf16 %v885_v22, %v889_v32  ;;  %380 = vperm.xlu0 %841, %v302_v53   ;;  %v1321_v17 = vpop.permute.xlu2 %330 }
 0x107   :  { %v893_v42 = vpop.eup %892  ;;  %904 = vtanh.f32 %v1168_v57  ;;  %v284_v47 = vpack.c.bf16 %v887_v28, %v891_v38  ;;  %v297_v57 = vld [vmem:[%s1382_s3 + $0x50] sm:$0xff] }
 0x108   :  { %v895_v48 = vpop.eup %894  ;;  %906 = vtanh.f32 %v1170_v58  ;;  %432 = vmatpush.bf16.msra.mxu2 %v283_v41  ;;  %355 = vperm.xlu1 %842, %v297_v57  }
 0x109   :  { %v897_v52 = vpop.eup %896  ;;  %481 = vmatpush.bf16.msra.mxu3 %v284_v47 }
 0x10a   :  { %v899_v61 = vpop.eup %898  ;;  %v281_v63 = vpack.c.bf16 %v893_v42, %v897_v52 }
 0x10b   :  { %v901_v62 = vpop.eup %900  ;;  %v282_v0 = vpack.c.bf16 %v895_v48, %v899_v61 }
 0x10c   :  { %v903_v1 = vpop.eup %902  ;;  %433 = vmatpush.bf16.msra.mxu2 %v281_v63 }
 0x10d   :  { %v905_v2 = vpop.eup %904  ;;  %482 = vmatpush.bf16.msra.mxu3 %v282_v0 }
 0x10e   :  { %v907_v58 = vpop.eup %906  ;;  %v279_v3 = vpack.c.bf16 %v901_v62, %v905_v2  ;;  %589 = vperm.xlu0 %841, %v563_v44   ;;  %v1328_v20 = vpop.permute.xlu1 %340 }
 0x10f   :  { %v280_v4 = vpack.c.bf16 %v903_v1, %v907_v58 }
 0x110   :  { %434 = vmatpush.bf16.msra.mxu2 %v279_v3  ;;  %370 = vperm.xlu1 %842, %v300_v6  }
 0x111   :  { %483 = vmatpush.bf16.msra.mxu3 %v280_v4 }
 0x114   :  { %435 = vmatpush.bf16.msra.mxu2 %v277_v59  ;;  %v834_v59 = vld [vmem:[%s1381_s2 + $0x18] sm:$0xff] }
 0x115   :  { %484 = vmatpush.bf16.msra.mxu3 %v278_v60  ;;  %v574_v60 = vld [vmem:[%s1383_s4 + $0x68] sm:$0xff] }
 0x116   :  { %604 = vperm.xlu0 %841, %v566_v25  }
 0x118   :  { %436 = vmatpush.bf16.msra.mxu2 %v275_v49  ;;  %579 = vperm.xlu1 %842, %v561_v54   ;;  %v576_v49 = vld [vmem:[%s1383_s4 + $0x78] sm:$0xff] }
 0x119   :  { %485 = vmatpush.bf16.msra.mxu3 %v276_v50  ;;  %v568_v50 = vld [vmem:[%s1383_s4 + $0x38] sm:$0xff] }
 0x11c   :  { %437 = vmatpush.bf16.msra.mxu2 %v273_v39  ;;  %v565_v39 = vld [vmem:[%s1383_s4 + $0x20] sm:$0xff] }
 0x11d   :  { %486 = vmatpush.bf16.msra.mxu3 %v274_v40  ;;  %v573_v40 = vld [vmem:[%s1383_s4 + $0x60] sm:$0xff]  ;;  %599 = vperm.xlu2 %843, %v565_v39   ;;  %v1330_v21 = vpop.permute.xlu2 %345 }
 0x120   :  { %438 = vmatpush.bf16.msra.mxu2 %v271_v29  ;;  %594 = vperm.xlu1 %842, %v564_v33   ;;  %v832_v29 = vld [vmem:[%s1381_s2 + $0x8] sm:$0xff]  ;;  %s999_s2 = smov [#allocation3]  }
 0x121   :  { %487 = vmatpush.bf16.msra.mxu3 %v272_v30  ;;  %v569_v30 = vld [vmem:[%s1383_s4 + $0x40] sm:$0xff]  ;;  %s756_s5 = sshll.u32 %s999_s2, 4  ;;  %s757_s5 = int_to_ptr.vmem [resolvable:$true] %s756_s5 }
 0x122   :  { %619 = vperm.xlu0 %841, %v569_v30  }
 0x123   :  { %439 = vmatmul.bf16.vlgmr.msra.gmra.mxu2 %v831_v43 }
 0x124   :  { %488 = vmatmul.bf16.vlgmr.msra.gmra.mxu3 %v831_v43 }
 0x125   :  { %614 = vperm.xlu2 %843, %v568_v50   ;;  %v1336_v28 = vpop.permute.xlu2 %360 }
 0x128   :  { %609 = vperm.xlu1 %842, %v567_v26  }
 0x12a   :  { %634 = vperm.xlu0 %841, %v572_v36  }
 0x12d   :  { %629 = vperm.xlu2 %843, %v571_v56   ;;  %v1342_v47 = vpop.permute.xlu2 %375 }
 0x12e   :  { %v1332_v22 = vpop.permute.xlu0 %350 }
 0x130   :  { %624 = vperm.xlu1 %842, %v570_v34  }
 0x132   :  { %649 = vperm.xlu0 %841, %v575_v46  }
 0x133   :  { %444 = vmatmul.bf16.gmra.mxu2 %v832_v29 }
 0x134   :  { %493 = vmatmul.bf16.gmra.mxu3 %v832_v29 }
 0x135   :  { %644 = vperm.xlu2 %843, %v574_v60   ;;  %v585_v58 = vpop.permute.xlu2 %584 }
 0x138   :  { %639 = vperm.xlu1 %842, %v573_v40  }
 0x13d   :  { %734 = vperm.xlu2 %843, %v731_v8  }
 0x140   :  { %654 = vperm.xlu1 %842, %v576_v49  }
 0x143   :  { %449 = vmatmul.bf16.gmra.mxu2 %v833_v45 }
 0x144   :  { %498 = vmatmul.bf16.gmra.mxu3 %v833_v45 }
 0x153   :  { %454 = vmatmul.bf16.gmra.mxu2 %v834_v59 }
 0x154   :  { %503 = vmatmul.bf16.gmra.mxu3 %v834_v59 }
 0x163   :  { %459 = vmatmul.bf16.gmra.mxu2 %v835_v9 }
 0x164   :  { %508 = vmatmul.bf16.gmra.mxu3 %v835_v9 }
 0x170   :  { %v1338_v37 = vpop.permute.xlu0 %365 }
 0x173   :  { %464 = vmatmul.bf16.gmra.mxu2 %v836_v10 }
 0x174   :  { %513 = vmatmul.bf16.gmra.mxu3 %v836_v10 }
 0x178   :  { %v1344_v62 = vpop.permute.xlu0 %380 }
 0x17a   :  { %v1334_v27 = vpop.permute.xlu1 %355 }
 0x180   :  { %v590_v25 = vpop.permute.xlu0 %589 }
 0x182   :  { %v1340_v42 = vpop.permute.xlu1 %370 }
 0x183   :  { %469 = vmatmul.bf16.gmra.mxu2 %v837_v11 }
 0x184   :  { %518 = vmatmul.bf16.gmra.mxu3 %v837_v11 }
 0x18a   :  { %v580_v57 = vpop.permute.xlu1 %579 }
 0x192   :  { %v595_v46 = vpop.permute.xlu1 %594 }
 0x193   :  { %474 = vmatmul.bf16.gmra.mxu2 %v838_v18 }
 0x194   :  { %523 = vmatmul.bf16.gmra.mxu3 %v838_v18 }
 0x1a6   :  { %v440_v31 = vpop.f32.mrf.mxu2 }
 0x1a7   :  { %v489_v32 = vpop.f32.mrf.mxu3  ;;  %v441_v38 = vadd.f32 %v440_v31, %v306_v12 }
 0x1a8   :  { %v490_v41 = vadd.f32 %v489_v32, %v306_v12 }
 0x1a9   :  { %908 = vtanh.f32 %v441_v38 }
 0x1aa   :  { %910 = vtanh.f32 %v490_v41 }
 0x1ae   :  { %v442_v48 = vpop.f32.mrf.mxu2 }
 0x1af   :  { %v443_v51 = vadd.f32 %v442_v48, %v311_v15  ;;  %v491_v52 = vpop.f32.mrf.mxu3  ;;  %v909_v63 = vpop.eup %908 }
 0x1b0   :  { %v492_v61 = vadd.f32 %v491_v52, %v311_v15  ;;  %v911_v0 = vpop.eup %910  ;;  %v657_v6 = vmul.f32 %v909_v63, %v580_v57 }
 0x1b1   :  { %912 = vtanh.f32 %v443_v51  ;;  %v658_v55 = vmul.f32 %v911_v0, %v580_v57 }
 0x1b2   :  { %914 = vtanh.f32 %v492_v61 }
 0x1b6   :  { %v445_v1 = vpop.f32.mrf.mxu2 }
 0x1b7   :  { %v913_v2 = vpop.eup %912  ;;  %v446_v3 = vadd.f32 %v445_v1, %v316_v13  ;;  %v494_v4 = vpop.f32.mrf.mxu3 }
 0x1b8   :  { %v915_v5 = vpop.eup %914  ;;  %v659_v7 = vmul.f32 %v913_v2, %v585_v58  ;;  %v495_v53 = vadd.f32 %v494_v4, %v316_v13  ;;  %v600_v13 = vpop.permute.xlu2 %599 }
 0x1b9   :  { %v660_v54 = vmul.f32 %v915_v5, %v585_v58  ;;  %916 = vtanh.f32 %v446_v3  ;;  %v605_v3 = vpop.permute.xlu0 %604 }
 0x1ba   :  { %v689_v43 = vadd.f32 %v659_v7, %v657_v6  ;;  %918 = vtanh.f32 %v495_v53 }
 0x1bb   :  { %v710_v44 = vadd.f32 %v660_v54, %v658_v55  ;;  %v610_v54 = vpop.permute.xlu1 %609 }
 0x1be   :  { %v447_v33 = vpop.f32.mrf.mxu2 }
 0x1bf   :  { %v917_v23 = vpop.eup %916  ;;  %v448_v24 = vadd.f32 %v447_v33, %v321_v16  ;;  %v496_v26 = vpop.f32.mrf.mxu3 }
 0x1c0   :  { %v919_v29 = vpop.eup %918  ;;  %v661_v30 = vmul.f32 %v917_v23, %v590_v25  ;;  %v497_v34 = vadd.f32 %v496_v26, %v321_v16 }
 0x1c1   :  { %v662_v35 = vmul.f32 %v919_v29, %v590_v25  ;;  %920 = vtanh.f32 %v448_v24  ;;  %v620_v29 = vpop.permute.xlu0 %619 }
 0x1c2   :  { %v690_v36 = vadd.f32 %v689_v43, %v661_v30  ;;  %922 = vtanh.f32 %v497_v34 }
 0x1c3   :  { %v711_v39 = vadd.f32 %v710_v44, %v662_v35 }
 0x1c6   :  { %v450_v40 = vpop.f32.mrf.mxu2 }
 0x1c7   :  { %v921_v45 = vpop.eup %920  ;;  %v451_v49 = vadd.f32 %v450_v40, %v1319_v14  ;;  %v499_v50 = vpop.f32.mrf.mxu3 }
 0x1c8   :  { %v923_v56 = vpop.eup %922  ;;  %v663_v59 = vmul.f32 %v921_v45, %v595_v46  ;;  %v500_v60 = vadd.f32 %v499_v50, %v1319_v14 }
 0x1c9   :  { %v664_v8 = vmul.f32 %v923_v56, %v595_v46  ;;  %924 = vtanh.f32 %v451_v49  ;;  %v625_v46 = vpop.permute.xlu1 %624 }
 0x1ca   :  { %v691_v9 = vadd.f32 %v690_v36, %v663_v59  ;;  %926 = vtanh.f32 %v500_v60 }
 0x1cb   :  { %v712_v10 = vadd.f32 %v711_v39, %v664_v8 }
 0x1ce   :  { %v452_v11 = vpop.f32.mrf.mxu2 }
 0x1cf   :  { %v925_v12 = vpop.eup %924  ;;  %v501_v15 = vpop.f32.mrf.mxu3  ;;  %v453_v4 = vadd.f32 %v452_v11, %v1321_v17 }
 0x1d0   :  { %v927_v16 = vpop.eup %926  ;;  %v665_v18 = vmul.f32 %v925_v12, %v600_v13  ;;  %v502_v5 = vadd.f32 %v501_v15, %v1321_v17  ;;  %v615_v17 = vpop.permute.xlu2 %614 }
 0x1d1   :  { %v666_v31 = vmul.f32 %v927_v16, %v600_v13  ;;  %928 = vtanh.f32 %v453_v4 }
 0x1d2   :  { %v1348_v32 = vadd.f32 %v691_v9, %v665_v18  ;;  %930 = vtanh.f32 %v502_v5 }
 0x1d3   :  { %v1350_v38 = vadd.f32 %v712_v10, %v666_v31 }
 0x1d6   :  { %v455_v41 = vpop.f32.mrf.mxu2 }
 0x1d7   :  { %v504_v48 = vpop.f32.mrf.mxu3  ;;  %v456_v7 = vadd.f32 %v455_v41, %v1326_v19  ;;  %v929_v26 = vpop.eup %928 }
 0x1d8   :  { %v505_v55 = vadd.f32 %v504_v48, %v1326_v19  ;;  %v931_v34 = vpop.eup %930  ;;  %v667_v40 = vmul.f32 %v929_v26, %v605_v3  ;;  %v630_v16 = vpop.permute.xlu2 %629 }
 0x1d9   :  { %932 = vtanh.f32 %v456_v7  ;;  %v668_v49 = vmul.f32 %v931_v34, %v605_v3  ;;  %v640_v7 = vpop.permute.xlu1 %639 }
 0x1da   :  { %934 = vtanh.f32 %v505_v55  ;;  %v693_v11 = vadd.f32 %v1348_v32, %v667_v40 }
 0x1db   :  { %v714_v18 = vadd.f32 %v1350_v38, %v668_v49 }
 0x1de   :  { %v457_v51 = vpop.f32.mrf.mxu2 }
 0x1df   :  { %v506_v14 = vpop.f32.mrf.mxu3  ;;  %v458_v43 = vadd.f32 %v457_v51, %v1328_v20  ;;  %v933_v36 = vpop.eup %932 }
 0x1e0   :  { %v507_v44 = vadd.f32 %v506_v14, %v1328_v20  ;;  %v935_v39 = vpop.eup %934  ;;  %v669_v59 = vmul.f32 %v933_v36, %v610_v54  ;;  %v645_v34 = vpop.permute.xlu2 %644 }
 0x1e1   :  { %936 = vtanh.f32 %v458_v43  ;;  %v670_v8 = vmul.f32 %v935_v39, %v610_v54 }
 0x1e2   :  { %938 = vtanh.f32 %v507_v44  ;;  %v694_v51 = vadd.f32 %v693_v11, %v669_v59 }
 0x1e6   :  { %v460_v52 = vpop.f32.mrf.mxu2 }
 0x1e7   :  { %v509_v61 = vpop.f32.mrf.mxu3  ;;  %v461_v33 = vadd.f32 %v460_v52, %v1330_v21  ;;  %v937_v45 = vpop.eup %936 }
 0x1e8   :  { %v510_v23 = vadd.f32 %v509_v61, %v1330_v21  ;;  %v939_v56 = vpop.eup %938  ;;  %v635_v61 = vpop.permute.xlu0 %634 }
 0x1e9   :  { %940 = vtanh.f32 %v461_v33  ;;  %v672_v31 = vmul.f32 %v939_v56, %v615_v17 }
 0x1ea   :  { %942 = vtanh.f32 %v510_v23 }
 0x1ee   :  { %v462_v63 = vpop.f32.mrf.mxu2 }
 0x1ef   :  { %v511_v0 = vpop.f32.mrf.mxu3  ;;  %v463_v25 = vadd.f32 %v462_v63, %v1332_v22  ;;  %v941_v60 = vpop.eup %940  ;;  %v715_v63 = vadd.f32 %v714_v18, %v670_v8 }
 0x1f0   :  { %v512_v19 = vadd.f32 %v511_v0, %v1332_v22  ;;  %v943_v10 = vpop.eup %942  ;;  %v673_v14 = vmul.f32 %v941_v60, %v620_v29  ;;  %v655_v8 = vpop.permute.xlu1 %654 }
 0x1f1   :  { %944 = vtanh.f32 %v463_v25 }
 0x1f2   :  { %946 = vtanh.f32 %v512_v19 }
 0x1f6   :  { %v465_v57 = vpop.f32.mrf.mxu2 }
 0x1f7   :  { %v514_v1 = vpop.f32.mrf.mxu3  ;;  %v466_v30 = vadd.f32 %v465_v57, %v1334_v27  ;;  %v945_v15 = vpop.eup %944 }
 0x1f8   :  { %v515_v35 = vadd.f32 %v514_v1, %v1334_v27  ;;  %v947_v48 = vpop.eup %946  ;;  %v675_v1 = vmul.f32 %v945_v15, %v625_v46 }
 0x1f9   :  { %948 = vtanh.f32 %v466_v30 }
 0x1fa   :  { %950 = vtanh.f32 %v515_v35 }
 0x1fe   :  { %v467_v2 = vpop.f32.mrf.mxu2 }
 0x1ff   :  { %v516_v58 = vpop.f32.mrf.mxu3  ;;  %v468_v21 = vadd.f32 %v467_v2, %v1336_v28  ;;  %v949_v52 = vpop.eup %948  ;;  %v716_v2 = vadd.f32 %v715_v63, %v672_v31 }
 0x200   :  { %v517_v22 = vadd.f32 %v516_v58, %v1336_v28  ;;  %v671_v28 = vmul.f32 %v937_v45, %v615_v17  ;;  %v951_v0 = vpop.eup %950  ;;  %v676_v58 = vmul.f32 %v947_v48, %v625_v46  ;;  %v677_v5 = vmul.f32 %v949_v52, %v630_v16 }
 0x201   :  { %952 = vtanh.f32 %v468_v21 }
 0x202   :  { %954 = vtanh.f32 %v517_v22  ;;  %v695_v57 = vadd.f32 %v694_v51, %v671_v28  ;;  %v650_v22 = vpop.permute.xlu0 %649 }
 0x204   :  { %v696_v4 = vadd.f32 %v695_v57, %v673_v14  ;;  %v746_v57 = vlaneseq }
 0x206   :  { %v470_v6 = vpop.f32.mrf.mxu2  ;;  %v697_v54 = vadd.f32 %v696_v4, %v675_v1  ;;  %vm748_vm2 = vcmp.lt.s32.totalorder %v746_v57, 256 }
 0x207   :  { %v519_v53 = vpop.f32.mrf.mxu3  ;;  %v471_v50 = vadd.f32 %v470_v6, %v1338_v37  ;;  %v953_v38 = vpop.eup %952 }
 0x208   :  { %v520_v27 = vadd.f32 %v519_v53, %v1338_v37  ;;  %v955_v3 = vpop.eup %954  ;;  %v678_v53 = vmul.f32 %v951_v0, %v630_v16  ;;  %v679_v43 = vmul.f32 %v953_v38, %v635_v61  ;;  %v698_v26 = vadd.f32 %v697_v54, %v677_v5 }
 0x209   :  { %956 = vtanh.f32 %v471_v50  ;;  %v680_v17 = vmul.f32 %v955_v3, %v635_v61 }
 0x20a   :  { %958 = vtanh.f32 %v520_v27  ;;  %v699_v39 = vadd.f32 %v698_v26, %v679_v43 }
 0x20e   :  { %v472_v24 = vpop.f32.mrf.mxu2 }
 0x20f   :  { %v521_v20 = vpop.f32.mrf.mxu3  ;;  %v473_v9 = vadd.f32 %v472_v24, %v1340_v42  ;;  %v957_v6 = vpop.eup %956 }
 0x210   :  { %v522_v12 = vadd.f32 %v521_v20, %v1340_v42  ;;  %v674_v42 = vmul.f32 %v943_v10, %v620_v29  ;;  %v959_v55 = vpop.eup %958  ;;  %v681_v29 = vmul.f32 %v957_v6, %v640_v7 }
 0x211   :  { %960 = vtanh.f32 %v473_v9  ;;  %v682_v36 = vmul.f32 %v959_v55, %v640_v7 }
 0x212   :  { %962 = vtanh.f32 %v522_v12  ;;  %v700_v49 = vadd.f32 %v699_v39, %v681_v29 }
 0x216   :  { %v475_v13 = vpop.f32.mrf.mxu2 }
 0x217   :  { %v476_v37 = vadd.f32 %v475_v13, %v1342_v47  ;;  %v524_v41 = vpop.f32.mrf.mxu3  ;;  %v961_v33 = vpop.eup %960 }
 0x218   :  { %v525_v32 = vadd.f32 %v524_v41, %v1342_v47  ;;  %v717_v47 = vadd.f32 %v716_v2, %v674_v42  ;;  %v963_v24 = vpop.eup %962  ;;  %v683_v40 = vmul.f32 %v961_v33, %v645_v34 }
 0x219   :  { %964 = vtanh.f32 %v476_v37  ;;  %v684_v46 = vmul.f32 %v963_v24, %v645_v34 }
 0x21a   :  { %966 = vtanh.f32 %v525_v32  ;;  %v718_v23 = vadd.f32 %v717_v47, %v676_v58  ;;  %v701_v27 = vadd.f32 %v700_v49, %v683_v40  ;;  %v735_v32 = vpop.permute.xlu2 %734 }
 0x21b   :  { %v737_v63 = vperm.slane %v735_v32, 0 }
 0x21c   :  { %v719_v35 = vadd.f32 %v718_v23, %v678_v53 }
 0x21e   :  { %v477_v44 = vpop.f32.mrf.mxu2  ;;  %v720_v45 = vadd.f32 %v719_v35, %v680_v17 }
 0x21f   :  { %v478_v25 = vadd.f32 %v477_v44, %v1344_v62  ;;  %v526_v19 = vpop.f32.mrf.mxu3  ;;  %v965_v20 = vpop.eup %964 }
 0x220   :  { %v527_v30 = vadd.f32 %v526_v19, %v1344_v62  ;;  %v967_v21 = vpop.eup %966  ;;  %v685_v50 = vmul.f32 %v965_v20, %v650_v22  ;;  %v721_v56 = vadd.f32 %v720_v45, %v682_v36 }
 0x221   :  { %968 = vtanh.f32 %v478_v25  ;;  %v686_v59 = vmul.f32 %v967_v21, %v650_v22 }
 0x222   :  { %970 = vtanh.f32 %v527_v30  ;;  %v722_v62 = vadd.f32 %v721_v56, %v684_v46  ;;  %v702_v10 = vadd.f32 %v701_v27, %v685_v50 }
 0x224   :  { %v723_v28 = vadd.f32 %v722_v62, %v686_v59 }
 0x227   :  { %v969_v60 = vpop.eup %968 }
 0x228   :  { %v971_v9 = vpop.eup %970  ;;  %v687_v11 = vmul.f32 %v969_v60, %v655_v8 }
 0x229   :  { %v688_v12 = vmul.f32 %v971_v9, %v655_v8 }
 0x22a   :  { %v703_v13 = vadd.f32 %v702_v10, %v687_v11 }
 0x22b   :  { %v724_v15 = vadd.f32 %v723_v28, %v688_v12 }
 0x22c   :  { %v704_v16 = vrot.slane %v703_v13, 4 }
 0x22d   :  { %v725_v18 = vrot.slane %v724_v15, 4 }
 0x22e   :  { %v705_v31 = vadd.f32 %v704_v16, %v703_v13 }
 0x22f   :  { %v726_v37 = vadd.f32 %v725_v18, %v724_v15 }
 0x230   :  { %v706_v41 = vrot.slane %v705_v31, 2 }
 0x231   :  { %v727_v48 = vrot.slane %v726_v37, 2 }
 0x232   :  { %v707_v51 = vadd.f32 %v706_v41, %v705_v31 }
 0x233   :  { %v728_v14 = vadd.f32 %v727_v48, %v726_v37 }
 0x234   :  { %v708_v52 = vrot.slane %v707_v51, 1 }
 0x235   :  { %v729_v61 = vrot.slane %v728_v14, 1 }
 0x236   :  { %v709_v42 = vadd.f32 %v708_v52, %v707_v51 }
 0x237   :  { %v730_v0 = vadd.f32 %v729_v61, %v728_v14 }
 0x238   :  { %v738_v38 = vadd.f32 %v737_v63, %v709_v42 }
 0x239   :  { %v739_v1 = vadd.f32 %v737_v63, %v730_v0 }
 0x23b   :  { %v742_v2 = vrot.slane %v739_v1, 7 }
 0x23d   :  { %v744_v58 = vsel %vm743_vm1, %v738_v38, %v742_v2 }
 0x23e   :  { %750 = vst.msk [vmem:[#allocation3] sm:$0x3] %vm748_vm2, %v744_v58 }
 0x23f   :  { %761 = dma.vmem_to_hbm [thread:$0]  %s757_s5, 32, %s759_s30, [#allocation4]  }
 0x240   :  { %996 = dma.done.wait [#allocation4], 32  }
 0x241   :  { %997 = vsyncadd [#allocation4], 4294967264 }
 0x242   :  { %766 = vsyncpa [#allocation4], 1 }

</bundles_post_ra>
